<compile_context>
chip_gen: v7x
topology: tpu7x:2x2x1
jax: 0.10.0
libtpu: 0.0.40
codegen_flags: <defaults>
</compile_context>

<pallas_src>
import numpy as np
import jax
import jax.numpy as jnp
from jax.experimental import pallas as pl
from jax.experimental.pallas import tpu as pltpu

EPS = 0.1   # epsilon of g(x) = 1 / (x/eps + 1) = eps / (x + eps)


def _round_up(v, mult):
    return ((v + mult - 1) // mult) * mult


def _make_alista_kernel(k, p_list):
    p_list = tuple(int(p) for p in p_list)
    assert len(p_list) == k

    def _pth_largest(abs_z, p):
        """p-th largest (with multiplicity) of abs_z per row along the lane axis.

        Equals min(torch.topk(abs_z, p)) per row. p masked-max passes with an
        incremental multiplicity count (the masked stream feeds both the max
        and the count reduction): after pass t, `thresh` is the t-th distinct
        value and `count` the cumulative multiplicity; the first candidate
        whose cumulative count reaches p is kept.
        """
        rows = abs_z.shape[0]
        thresh = jnp.full((rows, 1), jnp.inf, jnp.float32)
        count = jnp.zeros((rows, 1), jnp.float32)   # exact for n < 2**24
        for _ in range(p):
            active = count < float(p)
            masked = jnp.where(abs_z < thresh, abs_z, -jnp.inf)
            nxt = jnp.max(masked, axis=-1, keepdims=True)
            # multiplicity of `nxt` among the not-yet-counted entries
            delta = jnp.sum((masked >= nxt).astype(jnp.float32),
                            axis=-1, keepdims=True)
            thresh = jnp.where(active, nxt, thresh)
            count = jnp.where(active, count + delta, count)
        return thresh

    def kernel(y_ref, phit_ref, w_ref, gamma_ref, theta_ref, out_ref):
        y = y_ref[...]        # (TB, m) f32
        phit = phit_ref[...]  # (n, m)  bf16 == phi.T
        w = w_ref[...]        # (m, n)  bf16

        x = None
        for i in range(k):    # k small, p_list[i] static -> unroll
            if i == 0:
                # x == 0: a = 0, b = -y, c.T = -(y @ W), z = -gamma_0 * c.T
                z = gamma_ref[0] * jnp.dot(y.astype(jnp.bfloat16), w,
                                           preferred_element_type=jnp.float32)
                theta = theta_ref[0]          # g(0) = 1 -> scalar broadcast
            else:
                # a = phi @ x  ->  a.T = x.T @ phi.T
                a_t = jnp.dot(x.astype(jnp.bfloat16), phit,
                              preferred_element_type=jnp.float32)     # (TB, m)
                b_t = (a_t - y).astype(jnp.bfloat16)                  # (TB, m)
                # c = W.T @ b  ->  c.T = b.T @ W
                c_t = jnp.dot(b_t, w,
                              preferred_element_type=jnp.float32)     # (TB, n)
                # theta_i * g(|x|) = (theta_i*eps) / (|x| + eps).
                # Exact divide (EUP); the previously-used approx reciprocal
                # was the source of the reference mismatch.
                theta = (theta_ref[i] * EPS) / (jnp.abs(x) + EPS)     # (TB, n)
                z = x - gamma_ref[i] * c_t                            # (TB, n)

            # soft threshold without sign()/relu():  z - clip(z, -theta, theta)
            soft = z - jnp.clip(z, -theta, theta)

            p = p_list[i]
            if p == 0:
                x = soft
            else:
                abs_z = jnp.abs(z)
                thresh = _pth_largest(abs_z, p)                       # (TB, 1)
                x = jnp.where(abs_z > thresh, z, soft)
        out_ref[...] = x

    return kernel


def alista_at_forward(y, phi, W, gamma, theta, p_list, info=None, tb=None):
    """Mirrors ALISTA_AT.forward(y, info). Returns (x.T, zeros(k,1), zeros(k,1))."""
    B, m = y.shape
    n = phi.shape[1]
    k = int(gamma.shape[0])
    assert all(int(p) <= n for p in p_list)

    # Generation-aware VMEM capacity (per TensorCore); conservative fallback.
    try:
        vmem_cap = int(pltpu.get_tpu_info().vmem_capacity_bytes)
    except Exception:
        vmem_cap = 64 * 2 ** 20            # v7x per-TC VMEM

    # Lane-dense padding of m / n to multiples of 128 (unmasked stores, filled
    # MXU tiles). Zero-padded rows/cols keep the iterate exactly zero there and
    # never perturb the top-p threshold (n >= p, zeros never enter the top p).
    m_pad, n_pad = _round_up(m, 128), _round_up(n, 128)
    assert n_pad < 2 ** 24                 # multiplicity count exact in f32
    if m_pad != m or n_pad != n:
        phi = jnp.pad(phi, ((0, m_pad - m), (0, n_pad - n)))
        W = jnp.pad(W, ((0, m_pad - m), (0, n_pad - n)))
        y = jnp.pad(y, ((0, 0), (0, m_pad - m)))

    # Batch-tile heuristic:
    #  * B <= 256: at least two grid steps so both v7x TensorCores engage.
    #  * large B: 256 default; 512 on 128-MiB chips (v5e/v6e); 128 on v7x when
    #    n is large (the unrolled k-loop keeps ~10 (tb, n) f32 temporaries live).
    if tb is None:
        if B > 256:
            if vmem_cap < 96 * 2 ** 20 and n_pad >= 2048:
                tb = 128
            elif vmem_cap >= 96 * 2 ** 20 and B >= 512:
                tb = 512
            else:
                tb = 256
        else:
            tb = _round_up(pl.cdiv(B, 2), 8)
    tb = min(tb, B)
    if tb != B and tb % 8 != 0:
        tb = min(_round_up(tb, 8), B)
    grid = (pl.cdiv(B, tb),)

    # bf16 weights: half the resident VMEM / DMA bytes, native MXU operands.
    phit_bf = jnp.transpose(phi).astype(jnp.bfloat16)   # (n_pad, m_pad)
    w_bf = W.astype(jnp.bfloat16)                       # (m_pad, n_pad)

    # VMEM budget: weights single-buffered (constant index_map, Buffered(1)),
    # y/out tiles double-buffered, ~10 live (tb, max(m,n)) f32 temporaries.
    weights_bytes = 2 * m_pad * n_pad * 2
    tile_bytes = 2 * tb * (m_pad + n_pad) * 4
    temp_bytes = 10 * tb * max(m_pad, n_pad) * 4
    need = weights_bytes + tile_bytes + temp_bytes
    vmem_ceiling = (vmem_cap * 7) // 8     # ~56 MiB on v7x, ~112 MiB on v5e/v6e
    vmem_limit = int(min(max(int(1.25 * need), 32 * 2 ** 20), vmem_ceiling))

    cost = pl.CostEstimate(
        flops=2 * B * m_pad * n_pad * (2 * k - 1),   # i==0 peephole drops one matmul
        transcendentals=B * n_pad * (k - 1),         # divide in g(|x|)
        bytes_accessed=B * m_pad * 4 + 2 * m_pad * n_pad * 2 + B * n_pad * 4,
    )

    kernel = _make_alista_kernel(k, p_list)
    x_t = pl.pallas_call(
        kernel,
        out_shape=jax.ShapeDtypeStruct((B, n_pad), jnp.float32),
        grid=grid,
        in_specs=[
            pl.BlockSpec((tb, m_pad), lambda i: (i, 0)),             # y tile
            pl.BlockSpec((n_pad, m_pad), lambda i: (0, 0),
                         pipeline_mode=pl.Buffered(1)),              # phi.T resident
            pl.BlockSpec((m_pad, n_pad), lambda i: (0, 0),
                         pipeline_mode=pl.Buffered(1)),              # W resident
            pl.BlockSpec(memory_space=pltpu.MemorySpace.SMEM),       # gamma (k,)
            pl.BlockSpec(memory_space=pltpu.MemorySpace.SMEM),       # theta (k,)
        ],
        out_specs=pl.BlockSpec((tb, n_pad), lambda i: (i, 0)),
        compiler_params=pltpu.CompilerParams(
            dimension_semantics=("parallel",),       # 2-TC sharding on v7x
            vmem_limit_bytes=vmem_limit),
        cost_estimate=cost,
    )(y, phit_bf, w_bf, gamma, theta)
    if n_pad != n:
        x_t = x_t[:, :n]
    return x_t, jnp.zeros((k, 1), jnp.float32), jnp.zeros((k, 1), jnp.float32)


def alista_at_reference(y, phi, W, gamma, theta, p_list):
    """Plain-JAX reference mirroring the PyTorch (n, B) column-major code.

    Uses the same bf16-operand / f32-accumulation matmuls as the kernel so the
    comparison only reflects accumulation order; g() is exact in both.
    """
    n = phi.shape[1]
    x = jnp.zeros((n, y.shape[0]), jnp.float32)
    phi_bf = phi.astype(jnp.bfloat16)
    wt_bf = W.T.astype(jnp.bfloat16)
    for i in range(len(p_list)):
        a = jnp.matmul(phi_bf, x.astype(jnp.bfloat16),
                       preferred_element_type=jnp.float32)
        b = a - y.T
        c = jnp.matmul(wt_bf, b.astype(jnp.bfloat16),
                       preferred_element_type=jnp.float32)
        theta_i = theta[i] * (1.0 / (jnp.abs(x) / EPS + 1.0))
        z = x - gamma[i] * c
        abs_z = jnp.abs(z)
        soft = jnp.sign(z) * jnp.maximum(abs_z - theta_i, 0.0)
        p = int(p_list[i])
        if p == 0:
            x = soft
        else:
            thr = jnp.min(jax.lax.top_k(abs_z.T, p)[0], axis=-1)   # (B,)
            x = jnp.where(abs_z > thr[None, :], z, soft)
    return x.T


if __name__ == "__main__":
    # Small shapes consistent with the module: batch B, measurements m,
    # sparse code size n, k unfolded iterations. n, m lane-dense; the tb
    # heuristic picks tb=8 -> a 2-step pipelined batch grid.
    B, m, n, k = 16, 128, 256, 4
    p_list = [0, 0, 3, 5]   # exercise both soft_threshold branches

    key = jax.random.PRNGKey(0)
    k_phi, k_w, k_y = jax.random.split(key, 3)
    phi = jax.random.normal(k_phi, (m, n), jnp.float32) / np.sqrt(m)
    W = jax.random.normal(k_w, (m, n), jnp.float32) / np.sqrt(m)
    y = jax.random.normal(k_y, (B, m), jnp.float32)

    # Deterministic parameter init as in __init__: gamma_i = theta_i = 0.5
    gamma = jnp.full((k,), 0.5, jnp.float32)
    theta = jnp.full((k,), 0.5, jnp.float32)

    x_t, aux1, aux2 = alista_at_forward(y, phi, W, gamma, theta, p_list, info=None)
    jax.block_until_ready(x_t)

    ref = alista_at_reference(y, phi, W, gamma, theta, p_list)
    # bf16 MXU operands in both paths; g() is now exact, so only matmul
    # accumulation order differs.
    np.testing.assert_allclose(np.asarray(x_t), np.asarray(ref),
                               rtol=1e-2, atol=1e-2)
    assert x_t.shape == (B, n)
    assert aux1.shape == (k, 1) and aux2.shape == (k, 1)
    print("KERNEL_OK")
</pallas_src>

<mosaic_0001>
module attributes {stable_mosaic.version = 11 : i64} {
  func.func @kernel(%arg0: i32, %arg1: memref<8x128xf32, #tpu.memory_space<vmem>>, %arg2: memref<256x128xbf16, #tpu.memory_space<vmem>>, %arg3: memref<128x256xbf16, #tpu.memory_space<vmem>>, %arg4: memref<4xf32, #tpu.memory_space<smem>>, %arg5: memref<4xf32, #tpu.memory_space<smem>>, %arg6: memref<8x256xf32, #tpu.memory_space<vmem>>) attributes {dimension_semantics = [#tpu.dimension_semantics<parallel>], iteration_bounds = array<i64: 2>, scalar_prefetch = 0 : i64, scratch_operands = 0 : i64, tpu.core_type = #tpu.core_type<tc>, window_params = [{transform_indices = @transform_0, window_bounds = array<i64: 8, 128>}, {pipeline_mode = #tpu.pipeline_mode<synchronous>, transform_indices = @transform_1, window_bounds = array<i64: 256, 128>}, {pipeline_mode = #tpu.pipeline_mode<synchronous>, transform_indices = @transform_2, window_bounds = array<i64: 128, 256>}, {transform_indices = @transform_3, window_bounds = array<i64: 4>}, {transform_indices = @transform_4, window_bounds = array<i64: 4>}, {transform_indices = @transform_5, window_bounds = array<i64: 8, 256>}]} {
    %c0 = arith.constant 0 : index
    %c0_0 = arith.constant 0 : index
    %0 = vector.load %arg1[%c0, %c0_0] : memref<8x128xf32, #tpu.memory_space<vmem>>, vector<8x128xf32>
    %c0_1 = arith.constant 0 : index
    %c0_2 = arith.constant 0 : index
    %1 = vector.load %arg2[%c0_1, %c0_2] : memref<256x128xbf16, #tpu.memory_space<vmem>>, vector<256x128xbf16>
    %c0_3 = arith.constant 0 : index
    %c0_4 = arith.constant 0 : index
    %2 = vector.load %arg3[%c0_3, %c0_4] : memref<128x256xbf16, #tpu.memory_space<vmem>>, vector<128x256xbf16>
    %c0_5 = arith.constant 0 : index
    %3 = memref.load %arg4[%c0_5] : memref<4xf32, #tpu.memory_space<smem>>
    %4 = arith.truncf %0 : vector<8x128xf32> to vector<8x128xbf16>
    %cst = arith.constant dense<0.000000e+00> : vector<8x256xf32>
    %5 = tpu.matmul %4, %2, %cst {dimension_numbers = #tpu.dot_dimension_numbers<[1], [0], [0], [1], [0, 0, 1, 1], [], []>} : vector<8x128xbf16>, vector<128x256xbf16>, vector<8x256xf32> -> vector<8x256xf32>
    %6 = vector.broadcast %3 : f32 to vector<8x256xf32>
    %7 = arith.mulf %6, %5 : vector<8x256xf32>
    %c0_6 = arith.constant 0 : index
    %8 = memref.load %arg5[%c0_6] : memref<4xf32, #tpu.memory_space<smem>>
    %cst_7 = arith.constant 0.000000e+00 : f32
    %9 = arith.subf %cst_7, %8 : f32
    %10 = vector.broadcast %9 : f32 to vector<8x256xf32>
    %11 = arith.maximumf %10, %7 : vector<8x256xf32>
    %12 = vector.broadcast %8 : f32 to vector<8x256xf32>
    %13 = arith.minimumf %12, %11 : vector<8x256xf32>
    %14 = arith.subf %7, %13 : vector<8x256xf32>
    %15 = arith.truncf %14 : vector<8x256xf32> to vector<8x256xbf16>
    %cst_8 = arith.constant dense<0.000000e+00> : vector<8x128xf32>
    %16 = tpu.matmul %15, %1, %cst_8 {dimension_numbers = #tpu.dot_dimension_numbers<[1], [0], [0], [1], [0, 0, 1, 1], [], []>} : vector<8x256xbf16>, vector<256x128xbf16>, vector<8x128xf32> -> vector<8x128xf32>
    %17 = arith.subf %16, %0 : vector<8x128xf32>
    %18 = arith.truncf %17 : vector<8x128xf32> to vector<8x128xbf16>
    %cst_9 = arith.constant dense<0.000000e+00> : vector<8x256xf32>
    %19 = tpu.matmul %18, %2, %cst_9 {dimension_numbers = #tpu.dot_dimension_numbers<[1], [0], [0], [1], [0, 0, 1, 1], [], []>} : vector<8x128xbf16>, vector<128x256xbf16>, vector<8x256xf32> -> vector<8x256xf32>
    %c1 = arith.constant 1 : index
    %20 = memref.load %arg5[%c1] : memref<4xf32, #tpu.memory_space<smem>>
    %cst_10 = arith.constant 1.000000e-01 : f32
    %21 = arith.mulf %20, %cst_10 : f32
    %22 = math.absf %14 : vector<8x256xf32>
    %cst_11 = arith.constant 1.000000e-01 : f32
    %23 = vector.broadcast %cst_11 : f32 to vector<8x256xf32>
    %24 = arith.addf %22, %23 : vector<8x256xf32>
    %25 = vector.broadcast %21 : f32 to vector<8x256xf32>
    %26 = arith.divf %25, %24 : vector<8x256xf32>
    %c1_12 = arith.constant 1 : index
    %27 = memref.load %arg4[%c1_12] : memref<4xf32, #tpu.memory_space<smem>>
    %28 = vector.broadcast %27 : f32 to vector<8x256xf32>
    %29 = arith.mulf %28, %19 : vector<8x256xf32>
    %30 = arith.subf %14, %29 : vector<8x256xf32>
    %cst_13 = arith.constant 0.000000e+00 : f32
    %31 = vector.broadcast %cst_13 : f32 to vector<8x256xf32>
    %32 = arith.subf %31, %26 : vector<8x256xf32>
    %33 = arith.maximumf %32, %30 : vector<8x256xf32>
    %34 = arith.minimumf %26, %33 : vector<8x256xf32>
    %35 = arith.subf %30, %34 : vector<8x256xf32>
    %36 = arith.truncf %35 : vector<8x256xf32> to vector<8x256xbf16>
    %cst_14 = arith.constant dense<0.000000e+00> : vector<8x128xf32>
    %37 = tpu.matmul %36, %1, %cst_14 {dimension_numbers = #tpu.dot_dimension_numbers<[1], [0], [0], [1], [0, 0, 1, 1], [], []>} : vector<8x256xbf16>, vector<256x128xbf16>, vector<8x128xf32> -> vector<8x128xf32>
    %38 = arith.subf %37, %0 : vector<8x128xf32>
    %39 = arith.truncf %38 : vector<8x128xf32> to vector<8x128xbf16>
    %cst_15 = arith.constant dense<0.000000e+00> : vector<8x256xf32>
    %40 = tpu.matmul %39, %2, %cst_15 {dimension_numbers = #tpu.dot_dimension_numbers<[1], [0], [0], [1], [0, 0, 1, 1], [], []>} : vector<8x128xbf16>, vector<128x256xbf16>, vector<8x256xf32> -> vector<8x256xf32>
    %c2 = arith.constant 2 : index
    %41 = memref.load %arg5[%c2] : memref<4xf32, #tpu.memory_space<smem>>
    %cst_16 = arith.constant 1.000000e-01 : f32
    %42 = arith.mulf %41, %cst_16 : f32
    %43 = math.absf %35 : vector<8x256xf32>
    %cst_17 = arith.constant 1.000000e-01 : f32
    %44 = vector.broadcast %cst_17 : f32 to vector<8x256xf32>
    %45 = arith.addf %43, %44 : vector<8x256xf32>
    %46 = vector.broadcast %42 : f32 to vector<8x256xf32>
    %47 = arith.divf %46, %45 : vector<8x256xf32>
    %c2_18 = arith.constant 2 : index
    %48 = memref.load %arg4[%c2_18] : memref<4xf32, #tpu.memory_space<smem>>
    %49 = vector.broadcast %48 : f32 to vector<8x256xf32>
    %50 = arith.mulf %49, %40 : vector<8x256xf32>
    %51 = arith.subf %35, %50 : vector<8x256xf32>
    %cst_19 = arith.constant 0.000000e+00 : f32
    %52 = vector.broadcast %cst_19 : f32 to vector<8x256xf32>
    %53 = arith.subf %52, %47 : vector<8x256xf32>
    %54 = arith.maximumf %53, %51 : vector<8x256xf32>
    %55 = arith.minimumf %47, %54 : vector<8x256xf32>
    %56 = arith.subf %51, %55 : vector<8x256xf32>
    %57 = math.absf %51 : vector<8x256xf32>
    %cst_20 = arith.constant 0x7F800000 : f32
    %58 = vector.broadcast %cst_20 : f32 to vector<8x1xf32>
    %cst_21 = arith.constant 0.000000e+00 : f32
    %59 = vector.broadcast %cst_21 : f32 to vector<8x1xf32>
    %cst_22 = arith.constant 3.000000e+00 : f32
    %60 = vector.broadcast %cst_22 : f32 to vector<8x1xf32>
    %61 = arith.cmpf olt, %59, %60 : vector<8x1xf32>
    %62 = vector.broadcast %58 : vector<8x1xf32> to vector<8x256xf32>
    %63 = arith.cmpf olt, %57, %62 : vector<8x256xf32>
    %cst_23 = arith.constant 0xFF800000 : f32
    %64 = vector.broadcast %cst_23 : f32 to vector<8x256xf32>
    %65 = arith.select %63, %57, %64 : vector<8x256xi1>, vector<8x256xf32>
    %cst_24 = arith.constant dense<0xFF800000> : vector<8xf32>
    %66 = vector.multi_reduction <maximumf>, %65, %cst_24 [1] : vector<8x256xf32> to vector<8xf32>
    %67 = vector.shape_cast %66 : vector<8xf32> to vector<8x1xf32>
    %68 = vector.broadcast %67 : vector<8x1xf32> to vector<8x256xf32>
    %69 = arith.cmpf oge, %65, %68 : vector<8x256xf32>
    %70 = arith.extui %69 : vector<8x256xi1> to vector<8x256xi32>
    %71 = arith.sitofp %70 : vector<8x256xi32> to vector<8x256xf32>
    %cst_25 = arith.constant dense<0.000000e+00> : vector<8xf32>
    %72 = vector.multi_reduction <add>, %71, %cst_25 [1] : vector<8x256xf32> to vector<8xf32>
    %73 = vector.shape_cast %72 : vector<8xf32> to vector<8x1xf32>
    %74 = arith.select %61, %67, %58 : vector<8x1xi1>, vector<8x1xf32>
    %75 = arith.addf %59, %73 : vector<8x1xf32>
    %76 = arith.select %61, %75, %59 : vector<8x1xi1>, vector<8x1xf32>
    %cst_26 = arith.constant 3.000000e+00 : f32
    %77 = vector.broadcast %cst_26 : f32 to vector<8x1xf32>
    %78 = arith.cmpf olt, %76, %77 : vector<8x1xf32>
    %79 = vector.broadcast %74 : vector<8x1xf32> to vector<8x256xf32>
    %80 = arith.cmpf olt, %57, %79 : vector<8x256xf32>
    %cst_27 = arith.constant 0xFF800000 : f32
    %81 = vector.broadcast %cst_27 : f32 to vector<8x256xf32>
    %82 = arith.select %80, %57, %81 : vector<8x256xi1>, vector<8x256xf32>
    %cst_28 = arith.constant dense<0xFF800000> : vector<8xf32>
    %83 = vector.multi_reduction <maximumf>, %82, %cst_28 [1] : vector<8x256xf32> to vector<8xf32>
    %84 = vector.shape_cast %83 : vector<8xf32> to vector<8x1xf32>
    %85 = vector.broadcast %84 : vector<8x1xf32> to vector<8x256xf32>
    %86 = arith.cmpf oge, %82, %85 : vector<8x256xf32>
    %87 = arith.extui %86 : vector<8x256xi1> to vector<8x256xi32>
    %88 = arith.sitofp %87 : vector<8x256xi32> to vector<8x256xf32>
    %cst_29 = arith.constant dense<0.000000e+00> : vector<8xf32>
    %89 = vector.multi_reduction <add>, %88, %cst_29 [1] : vector<8x256xf32> to vector<8xf32>
    %90 = vector.shape_cast %89 : vector<8xf32> to vector<8x1xf32>
    %91 = arith.select %78, %84, %74 : vector<8x1xi1>, vector<8x1xf32>
    %92 = arith.addf %76, %90 : vector<8x1xf32>
    %93 = arith.select %78, %92, %76 : vector<8x1xi1>, vector<8x1xf32>
    %cst_30 = arith.constant 3.000000e+00 : f32
    %94 = vector.broadcast %cst_30 : f32 to vector<8x1xf32>
    %95 = arith.cmpf olt, %93, %94 : vector<8x1xf32>
    %96 = vector.broadcast %91 : vector<8x1xf32> to vector<8x256xf32>
    %97 = arith.cmpf olt, %57, %96 : vector<8x256xf32>
    %cst_31 = arith.constant 0xFF800000 : f32
    %98 = vector.broadcast %cst_31 : f32 to vector<8x256xf32>
    %99 = arith.select %97, %57, %98 : vector<8x256xi1>, vector<8x256xf32>
    %cst_32 = arith.constant dense<0xFF800000> : vector<8xf32>
    %100 = vector.multi_reduction <maximumf>, %99, %cst_32 [1] : vector<8x256xf32> to vector<8xf32>
    %101 = vector.shape_cast %100 : vector<8xf32> to vector<8x1xf32>
    %102 = arith.select %95, %101, %91 : vector<8x1xi1>, vector<8x1xf32>
    %103 = vector.broadcast %102 : vector<8x1xf32> to vector<8x256xf32>
    %104 = arith.cmpf ogt, %57, %103 : vector<8x256xf32>
    %105 = arith.select %104, %51, %56 : vector<8x256xi1>, vector<8x256xf32>
    %106 = arith.truncf %105 : vector<8x256xf32> to vector<8x256xbf16>
    %cst_33 = arith.constant dense<0.000000e+00> : vector<8x128xf32>
    %107 = tpu.matmul %106, %1, %cst_33 {dimension_numbers = #tpu.dot_dimension_numbers<[1], [0], [0], [1], [0, 0, 1, 1], [], []>} : vector<8x256xbf16>, vector<256x128xbf16>, vector<8x128xf32> -> vector<8x128xf32>
    %108 = arith.subf %107, %0 : vector<8x128xf32>
    %109 = arith.truncf %108 : vector<8x128xf32> to vector<8x128xbf16>
    %cst_34 = arith.constant dense<0.000000e+00> : vector<8x256xf32>
    %110 = tpu.matmul %109, %2, %cst_34 {dimension_numbers = #tpu.dot_dimension_numbers<[1], [0], [0], [1], [0, 0, 1, 1], [], []>} : vector<8x128xbf16>, vector<128x256xbf16>, vector<8x256xf32> -> vector<8x256xf32>
    %c3 = arith.constant 3 : index
    %111 = memref.load %arg5[%c3] : memref<4xf32, #tpu.memory_space<smem>>
    %cst_35 = arith.constant 1.000000e-01 : f32
    %112 = arith.mulf %111, %cst_35 : f32
    %113 = math.absf %105 : vector<8x256xf32>
    %cst_36 = arith.constant 1.000000e-01 : f32
    %114 = vector.broadcast %cst_36 : f32 to vector<8x256xf32>
    %115 = arith.addf %113, %114 : vector<8x256xf32>
    %116 = vector.broadcast %112 : f32 to vector<8x256xf32>
    %117 = arith.divf %116, %115 : vector<8x256xf32>
    %c3_37 = arith.constant 3 : index
    %118 = memref.load %arg4[%c3_37] : memref<4xf32, #tpu.memory_space<smem>>
    %119 = vector.broadcast %118 : f32 to vector<8x256xf32>
    %120 = arith.mulf %119, %110 : vector<8x256xf32>
    %121 = arith.subf %105, %120 : vector<8x256xf32>
    %cst_38 = arith.constant 0.000000e+00 : f32
    %122 = vector.broadcast %cst_38 : f32 to vector<8x256xf32>
    %123 = arith.subf %122, %117 : vector<8x256xf32>
    %124 = arith.maximumf %123, %121 : vector<8x256xf32>
    %125 = arith.minimumf %117, %124 : vector<8x256xf32>
    %126 = arith.subf %121, %125 : vector<8x256xf32>
    %127 = math.absf %121 : vector<8x256xf32>
    %cst_39 = arith.constant 0x7F800000 : f32
    %128 = vector.broadcast %cst_39 : f32 to vector<8x1xf32>
    %cst_40 = arith.constant 0.000000e+00 : f32
    %129 = vector.broadcast %cst_40 : f32 to vector<8x1xf32>
    %cst_41 = arith.constant 5.000000e+00 : f32
    %130 = vector.broadcast %cst_41 : f32 to vector<8x1xf32>
    %131 = arith.cmpf olt, %129, %130 : vector<8x1xf32>
    %132 = vector.broadcast %128 : vector<8x1xf32> to vector<8x256xf32>
    %133 = arith.cmpf olt, %127, %132 : vector<8x256xf32>
    %cst_42 = arith.constant 0xFF800000 : f32
    %134 = vector.broadcast %cst_42 : f32 to vector<8x256xf32>
    %135 = arith.select %133, %127, %134 : vector<8x256xi1>, vector<8x256xf32>
    %cst_43 = arith.constant dense<0xFF800000> : vector<8xf32>
    %136 = vector.multi_reduction <maximumf>, %135, %cst_43 [1] : vector<8x256xf32> to vector<8xf32>
    %137 = vector.shape_cast %136 : vector<8xf32> to vector<8x1xf32>
    %138 = vector.broadcast %137 : vector<8x1xf32> to vector<8x256xf32>
    %139 = arith.cmpf oge, %135, %138 : vector<8x256xf32>
    %140 = arith.extui %139 : vector<8x256xi1> to vector<8x256xi32>
    %141 = arith.sitofp %140 : vector<8x256xi32> to vector<8x256xf32>
    %cst_44 = arith.constant dense<0.000000e+00> : vector<8xf32>
    %142 = vector.multi_reduction <add>, %141, %cst_44 [1] : vector<8x256xf32> to vector<8xf32>
    %143 = vector.shape_cast %142 : vector<8xf32> to vector<8x1xf32>
    %144 = arith.select %131, %137, %128 : vector<8x1xi1>, vector<8x1xf32>
    %145 = arith.addf %129, %143 : vector<8x1xf32>
    %146 = arith.select %131, %145, %129 : vector<8x1xi1>, vector<8x1xf32>
    %cst_45 = arith.constant 5.000000e+00 : f32
    %147 = vector.broadcast %cst_45 : f32 to vector<8x1xf32>
    %148 = arith.cmpf olt, %146, %147 : vector<8x1xf32>
    %149 = vector.broadcast %144 : vector<8x1xf32> to vector<8x256xf32>
    %150 = arith.cmpf olt, %127, %149 : vector<8x256xf32>
    %cst_46 = arith.constant 0xFF800000 : f32
    %151 = vector.broadcast %cst_46 : f32 to vector<8x256xf32>
    %152 = arith.select %150, %127, %151 : vector<8x256xi1>, vector<8x256xf32>
    %cst_47 = arith.constant dense<0xFF800000> : vector<8xf32>
    %153 = vector.multi_reduction <maximumf>, %152, %cst_47 [1] : vector<8x256xf32> to vector<8xf32>
    %154 = vector.shape_cast %153 : vector<8xf32> to vector<8x1xf32>
    %155 = vector.broadcast %154 : vector<8x1xf32> to vector<8x256xf32>
    %156 = arith.cmpf oge, %152, %155 : vector<8x256xf32>
    %157 = arith.extui %156 : vector<8x256xi1> to vector<8x256xi32>
    %158 = arith.sitofp %157 : vector<8x256xi32> to vector<8x256xf32>
    %cst_48 = arith.constant dense<0.000000e+00> : vector<8xf32>
    %159 = vector.multi_reduction <add>, %158, %cst_48 [1] : vector<8x256xf32> to vector<8xf32>
    %160 = vector.shape_cast %159 : vector<8xf32> to vector<8x1xf32>
    %161 = arith.select %148, %154, %144 : vector<8x1xi1>, vector<8x1xf32>
    %162 = arith.addf %146, %160 : vector<8x1xf32>
    %163 = arith.select %148, %162, %146 : vector<8x1xi1>, vector<8x1xf32>
    %cst_49 = arith.constant 5.000000e+00 : f32
    %164 = vector.broadcast %cst_49 : f32 to vector<8x1xf32>
    %165 = arith.cmpf olt, %163, %164 : vector<8x1xf32>
    %166 = vector.broadcast %161 : vector<8x1xf32> to vector<8x256xf32>
    %167 = arith.cmpf olt, %127, %166 : vector<8x256xf32>
    %cst_50 = arith.constant 0xFF800000 : f32
    %168 = vector.broadcast %cst_50 : f32 to vector<8x256xf32>
    %169 = arith.select %167, %127, %168 : vector<8x256xi1>, vector<8x256xf32>
    %cst_51 = arith.constant dense<0xFF800000> : vector<8xf32>
    %170 = vector.multi_reduction <maximumf>, %169, %cst_51 [1] : vector<8x256xf32> to vector<8xf32>
    %171 = vector.shape_cast %170 : vector<8xf32> to vector<8x1xf32>
    %172 = vector.broadcast %171 : vector<8x1xf32> to vector<8x256xf32>
    %173 = arith.cmpf oge, %169, %172 : vector<8x256xf32>
    %174 = arith.extui %173 : vector<8x256xi1> to vector<8x256xi32>
    %175 = arith.sitofp %174 : vector<8x256xi32> to vector<8x256xf32>
    %cst_52 = arith.constant dense<0.000000e+00> : vector<8xf32>
    %176 = vector.multi_reduction <add>, %175, %cst_52 [1] : vector<8x256xf32> to vector<8xf32>
    %177 = vector.shape_cast %176 : vector<8xf32> to vector<8x1xf32>
    %178 = arith.select %165, %171, %161 : vector<8x1xi1>, vector<8x1xf32>
    %179 = arith.addf %163, %177 : vector<8x1xf32>
    %180 = arith.select %165, %179, %163 : vector<8x1xi1>, vector<8x1xf32>
    %cst_53 = arith.constant 5.000000e+00 : f32
    %181 = vector.broadcast %cst_53 : f32 to vector<8x1xf32>
    %182 = arith.cmpf olt, %180, %181 : vector<8x1xf32>
    %183 = vector.broadcast %178 : vector<8x1xf32> to vector<8x256xf32>
    %184 = arith.cmpf olt, %127, %183 : vector<8x256xf32>
    %cst_54 = arith.constant 0xFF800000 : f32
    %185 = vector.broadcast %cst_54 : f32 to vector<8x256xf32>
    %186 = arith.select %184, %127, %185 : vector<8x256xi1>, vector<8x256xf32>
    %cst_55 = arith.constant dense<0xFF800000> : vector<8xf32>
    %187 = vector.multi_reduction <maximumf>, %186, %cst_55 [1] : vector<8x256xf32> to vector<8xf32>
    %188 = vector.shape_cast %187 : vector<8xf32> to vector<8x1xf32>
    %189 = vector.broadcast %188 : vector<8x1xf32> to vector<8x256xf32>
    %190 = arith.cmpf oge, %186, %189 : vector<8x256xf32>
    %191 = arith.extui %190 : vector<8x256xi1> to vector<8x256xi32>
    %192 = arith.sitofp %191 : vector<8x256xi32> to vector<8x256xf32>
    %cst_56 = arith.constant dense<0.000000e+00> : vector<8xf32>
    %193 = vector.multi_reduction <add>, %192, %cst_56 [1] : vector<8x256xf32> to vector<8xf32>
    %194 = vector.shape_cast %193 : vector<8xf32> to vector<8x1xf32>
    %195 = arith.select %182, %188, %178 : vector<8x1xi1>, vector<8x1xf32>
    %196 = arith.addf %180, %194 : vector<8x1xf32>
    %197 = arith.select %182, %196, %180 : vector<8x1xi1>, vector<8x1xf32>
    %cst_57 = arith.constant 5.000000e+00 : f32
    %198 = vector.broadcast %cst_57 : f32 to vector<8x1xf32>
    %199 = arith.cmpf olt, %197, %198 : vector<8x1xf32>
    %200 = vector.broadcast %195 : vector<8x1xf32> to vector<8x256xf32>
    %201 = arith.cmpf olt, %127, %200 : vector<8x256xf32>
    %cst_58 = arith.constant 0xFF800000 : f32
    %202 = vector.broadcast %cst_58 : f32 to vector<8x256xf32>
    %203 = arith.select %201, %127, %202 : vector<8x256xi1>, vector<8x256xf32>
    %cst_59 = arith.constant dense<0xFF800000> : vector<8xf32>
    %204 = vector.multi_reduction <maximumf>, %203, %cst_59 [1] : vector<8x256xf32> to vector<8xf32>
    %205 = vector.shape_cast %204 : vector<8xf32> to vector<8x1xf32>
    %206 = arith.select %199, %205, %195 : vector<8x1xi1>, vector<8x1xf32>
    %207 = vector.broadcast %206 : vector<8x1xf32> to vector<8x256xf32>
    %208 = arith.cmpf ogt, %127, %207 : vector<8x256xf32>
    %209 = arith.select %208, %121, %126 : vector<8x256xi1>, vector<8x256xf32>
    %c0_60 = arith.constant 0 : index
    %c0_61 = arith.constant 0 : index
    %210 = vector.load %arg6[%c0_60, %c0_61] : memref<8x256xf32, #tpu.memory_space<vmem>>, vector<8x256xf32>
    tpu.vector_store %arg6[%c0_60, %c0_61], %209 {strides = array<i32>} : memref<8x256xf32, #tpu.memory_space<vmem>>, vector<8x256xf32>,
    return
  }
  func.func @transform_0(%arg0: i32) -> (i32, i32) {
    %c0_i32 = arith.constant 0 : i32
    %c0_i32_0 = arith.constant 0 : i32
    return %arg0, %c0_i32 : i32, i32
  }
  func.func @transform_1(%arg0: i32) -> (i32, i32) {
    %c0_i32 = arith.constant 0 : i32
    %c0_i32_0 = arith.constant 0 : i32
    %c0_i32_1 = arith.constant 0 : i32
    return %c0_i32, %c0_i32_0 : i32, i32
  }
  func.func @transform_2(%arg0: i32) -> (i32, i32) {
    %c0_i32 = arith.constant 0 : i32
    %c0_i32_0 = arith.constant 0 : i32
    %c0_i32_1 = arith.constant 0 : i32
    return %c0_i32, %c0_i32_0 : i32, i32
  }
  func.func @transform_3(%arg0: i32) -> i32 {
    %c0_i32 = arith.constant 0 : i32
    %c0_i32_0 = arith.constant 0 : i32
    return %c0_i32 : i32
  }
  func.func @transform_4(%arg0: i32) -> i32 {
    %c0_i32 = arith.constant 0 : i32
    %c0_i32_0 = arith.constant 0 : i32
    return %c0_i32 : i32
  }
  func.func @transform_5(%arg0: i32) -> (i32, i32) {
    %c0_i32 = arith.constant 0 : i32
    %c0_i32_0 = arith.constant 0 : i32
    return %arg0, %c0_i32 : i32, i32
  }
}

</mosaic_0001>

<bundles_post_ra>
// kernel: tpu_custom_call.1
= control target key start
LH: loop header
LB: loop body
LE: loop exit
PB: predicated region body
PF: predicated region fallthrough
CT: control target
= control target key end

     0   :  { %10 = vsyncpa [#allocation3], 0  ;;  %s2282_s0 = inlined_call_operand.hbm [shape: f32[16,128], index: 0, kind: input, shape index: {}]   ;;  %s2283_s1 = inlined_call_operand.hbm [shape: bf16[256,128], index: 1, kind: input, shape index: {}]   ;;  %s2284_s2 = inlined_call_operand.hbm [shape: bf16[128,256], index: 2, kind: input, shape index: {}]   ;;  %s2285_s3 = inlined_call_operand.vmem [shape: f32[4], index: 3, kind: input, shape index: {}]   ;;  %s2286_s4 = inlined_call_operand.vmem [shape: f32[4], index: 4, kind: input, shape index: {}]   ;;  %s2287_s5 = inlined_call_operand.hbm [shape: f32[16,256], index: 5, kind: output, shape index: {}]  }
   0x1   :  { %12 = vsyncpa [#allocation3 + $0x1], 0 }
   0x2   :  { %13 = vsyncpa [#allocation7], 0 }
   0x3   :  { %14 = vsyncpa [#allocation5], 0 }
   0x4   :  { %15 = vsyncpa [#allocation11], 0 }
   0x5   :  { %16 = vsyncpa [#allocation4], 0 }
   0x6   :  { %18 = vsyncpa [#allocation4 + $0x1], 0  ;;  %s1707_s18 = smov 0   ;;  %s1709_s19 = smov 0  }
   0x7   :  { %s1711_s20 = smov 0   ;;  %s1713_s21 = smov 0  }
   0x8 LB: > { %s1665_s22 = smov [#allocation6]   ;;  %s1728_s24 = sadd.s32 4294967295, %s1663_s21   ;;  %s1663_s21 = sphi %s1713_s21, %s2313_s21   ;;  %s1659_s20 = sphi %s1711_s20, %s2312_s20   ;;  %s1655_s19 = sphi %s1709_s19, %s2311_s19   ;;  %s1651_s18 = sphi %s1707_s18, %s2310_s18  }
   0x9   : > { %s177_s23 = sshll.u32 %s1665_s22, 4  ;;  %p1187_p0 = scmp.ge.s32.totalorder %s1663_s21, 1  ;;  %s1733_s23 = int_to_ptr.vmem [resolvable:$true] %s177_s23 }
   0xa   : > { %p2288_p1 = scmp.eq.s32.totalorder %s1728_s24, 0  ;;  %p165_p2 = scmp.lt.s32.totalorder %s1663_s21, 3 }
   0xb   : > { %s1666_s26 = smov [#allocation8]   ;;  %s204_s6 = sshll.u32 %s2285_s3, 4  ;;  %s1753_s6 = int_to_ptr.vmem [resolvable:$true] %s204_s6 }
   0xc   : > { %p1735_p3 = pnand %p1187_p0, %p165_p2  ;;  %s190_s27 = sshll.u32 %s1666_s26, 4  ;;  %s1748_s27 = int_to_ptr.vmem [resolvable:$true] %s190_s27 }
   0xd   : > { %s1469_s9 = scalar_lea.hbm %s2283_s1, 2048 }
   0xe   : > { %s2291_s25 = scalar_select %p1735_p3, 1, 0 }
   0xf   : > { %p1344_p5 = pneg %p1735_p3  ;;  %p1470_p7 = scmp.ne.s32.totalorder %s2283_s1, %s1469_s9 }
  0x10   : > { %p1476_p11 = scmp.lt.u32.totalorder %s1469_s9, %s2283_s1 }
  0x11   : > { %p1744_p6 = pnand %p1344_p5, %p2288_p1 }
  0x13   : > { %p1763_p8 = pneg %p1744_p6 }
  0x15   : > { %p1472_p9 = pnand %p1763_p8, %p1470_p7 }
  0x17   : > { %p1473_p10 = pneg %p1472_p9 }
  0x19   : > { %p1478_p12 = pnand %p1476_p11, %p1473_p10 }
  0x1b   : > { %1481 = shalt.err (!%p1478_p12)
}
  0x1c   : > { %s1482_s15 = scalar_lea.vmem %s1733_s23, 2048  ;;  %p1490_p5 = scmp.lt.s32.totalorder %s1733_s23, %s1733_s23 }
  0x1d   : > { %p1483_p13 = scmp.ne.s32.totalorder %s1733_s23, %s1482_s15  ;;  %p1491_p4 = scmp.lt.s32.totalorder %s1482_s15, %s1482_s15 }
  0x1f   : > { %p1485_p0 = pnand %p1483_p13, %p1763_p8  ;;  %p1492_p7 = por %p1491_p4, %p1490_p5 }
  0x21   : > { %p1486_p2 = pneg %p1485_p0 }
  0x23   : > { %p1493_p9 = pnand %p1492_p7, %p1486_p2 }
  0x25   : > { %1496 = shalt.err (!%p1493_p9)
}
  0x26   : > { %s1667_s16 = smov 64   ;;  %s1668_s17 = smov 4  }
  0x27   : > { %1347 = dma.hbm_to_vmem [thread:$0]  (!%p1744_p6), %s2283_s1, 2048, %s1733_s23, [#allocation7], %s1667_s16, %s1667_s16, %s1668_s17  }
  0x28   : > { %s1497_s7 = scalar_lea.hbm %s2284_s2, 2048 }
  0x29   : > { %p1498_p4 = scmp.ne.s32.totalorder %s2284_s2, %s1497_s7  ;;  %p1504_p12 = scmp.lt.u32.totalorder %s1497_s7, %s2284_s2 }
  0x2b   : > { %p1500_p10 = pnand %p1498_p4, %p1763_p8 }
  0x2d   : > { %p1501_p11 = pneg %p1500_p10 }
  0x2f   : > { %p1506_p13 = pnand %p1504_p12, %p1501_p11 }
  0x31   : > { %1509 = shalt.err (!%p1506_p13)
}
  0x32   : > { %s1510_s23 = scalar_lea.vmem %s1748_s27, 2048  ;;  %p1518_p7 = scmp.lt.s32.totalorder %s1748_s27, %s1748_s27 }
  0x33   : > { %p1511_p0 = scmp.ne.s32.totalorder %s1748_s27, %s1510_s23  ;;  %p1519_p9 = scmp.lt.s32.totalorder %s1510_s23, %s1510_s23 }
  0x35   : > { %p1513_p2 = pnand %p1511_p0, %p1763_p8  ;;  %p1520_p4 = por %p1519_p9, %p1518_p7 }
  0x37   : > { %p1514_p5 = pneg %p1513_p2 }
  0x39   : > { %p1521_p10 = pnand %p1520_p4, %p1514_p5 }
  0x3b   : > { %1524 = shalt.err (!%p1521_p10)
}
  0x3c   : > { %s1669_s13 = smov 128   ;;  %s1670_s14 = smov 8  }
  0x3d   : > { %1350 = dma.hbm_to_vmem [thread:$0]  (!%p1744_p6), %s2284_s2, 2048, %s1748_s27, [#allocation7], %s1669_s13, %s1669_s13, %s1670_s14  }
  0x3e   : > { %s215_s26 = sshll.u32 %s2286_s4, 4  ;;  %s1525_s29 = scalar_lea.vmem %s1753_s6, 16  ;;  %s216_s26 = int_to_ptr.vmem [resolvable:$true] %s215_s26 }
  0x3f   : > { %p1526_p11 = scmp.ne.s32.totalorder %s1753_s6, %s1525_s29  ;;  %p1533_p0 = scmp.lt.s32.totalorder %s1753_s6, %s1753_s6 }
  0x40   : > { %p1534_p2 = scmp.lt.s32.totalorder %s1525_s29, %s1525_s29 }
  0x41   : > { %p1528_p12 = pnand %p1526_p11, %p1763_p8 }
  0x42   : > { %p1535_p5 = por %p1534_p2, %p1533_p0 }
  0x43   : > { %p1529_p13 = pneg %p1528_p12 }
  0x45   : > { %p1536_p7 = pnand %p1535_p5, %p1529_p13 }
  0x47   : > { %1539 = shalt.err (!%p1536_p7)
}
  0x48   : > { %s1671_s30 = smov [#allocation9]   ;;  %s1540_s27 = scalar_lea.vmem %s216_s26, 16 }
  0x49   : > { %1353 = dma.vmem_to_smem (!%p1744_p6), %s1753_s6, 16, %s1671_s30, [#allocation5]  }
  0x4a   : > { %p1541_p9 = scmp.ne.s32.totalorder %s216_s26, %s1540_s27  ;;  %p1548_p11 = scmp.lt.s32.totalorder %s216_s26, %s216_s26 }
  0x4b   : > { %p1549_p12 = scmp.lt.s32.totalorder %s1540_s27, %s1540_s27 }
  0x4c   : > { %p1543_p4 = pnand %p1541_p9, %p1763_p8 }
  0x4d   : > { %p1550_p1 = por %p1549_p12, %p1548_p11 }
  0x4e   : > { %p1544_p10 = pneg %p1543_p4 }
  0x50   : > { %p1551_p3 = pnand %p1550_p1, %p1544_p10 }
  0x52   : > { %1554 = shalt.err (!%p1551_p3)
}
  0x53   : > { %s1672_s7 = smov [#allocation10]   ;;  %s1186_s6 = sadd.s32 4294967294, %s1663_s21  }
  0x54   : > { %1356 = dma.vmem_to_smem (!%p1744_p6), %s216_s26, 16, %s1672_s7, [#allocation11]  }
  0x55   : > { %s1825_s12 = sadd.s32 1, %s1663_s21   ;;  %s31_s8 = sadd.s32 1, %s1659_s20 }
  0x56   : > { %s28_s28 = ssub.s32 %s1663_s21, %s1825_s12  ;;  %p38_p3 = scmp.ne.s32.totalorder %s1659_s20, %s1655_s19 }
  0x57   : > { %p29_p1 = scmp.eq.s32.totalorder %s28_s28, 0  ;;  %p39_p8 = scmp.eq.s32.totalorder %s1663_s21, 0 }
  0x58   : > { %p44_p13 = scmp.ne.s32.totalorder %s1655_s19, %s1651_s18  ;;  %p2295_p2 = scmp.eq.s32.totalorder %s1728_s24, 0 }
  0x59   : > { %s1836_s9 = scalar_select %p29_p1, %s1659_s20, %s31_s8  }
  0x5a   : > { %p1838_p0 = por %p39_p8, %p38_p3  ;;  %p1844_p6 = por %p2295_p2, %p44_p13 }
  0x5b   : > { %p152_p5 = scmp.eq.s32.totalorder %s1728_s24, 1  ;;  %p158_p7 = scmp.eq.s32.totalorder %s1186_s6, 1 }
  0x5c   : > { %p1369_p9 = scmp.lt.s32.totalorder %s1663_s21, 2  ;;  %s226_s23 = sand.u32 1, %s1659_s20  }
  0x5d   : > { %p1851_p4 = por %p152_p5, %p38_p3  ;;  %p1855_p10 = por %p158_p7, %p44_p13 }
  0x5e   : > { %s1193_s15 = sshll.u32 %s226_s23, 3  ;;  %s1194_s16 = sshll.u32 %s1663_s21, 7 }
  0x5f   : > { %s2297_s13 = scalar_select %p1851_p4, 1, 0 }
  0x60   : > { %s2298_s14 = scalar_select %p1855_p10, 1, 0 }
  0x61   : > { %s1863_s26 = scalar_lea.hbm %s2282_s0, %s1194_s16  ;;  %s230_s29 = scalar_lea.vmem [#allocation2], %s1193_s15 }
  0x62   : > { %s237_s30 = sshll.u32 %s230_s29, 4  ;;  %p1869_p11 = pnand %p1369_p9, %p1838_p0  ;;  %s1865_s30 = int_to_ptr.vmem [resolvable:$true] %s237_s30 }
  0x63   : > { %s227_s7 = scalar_lea.sflag [#allocation3], %s226_s23  ;;  %s1555_s6 = scalar_lea.hbm %s1863_s26, 128 }
  0x64   : > { %p1556_p12 = scmp.ne.s32.totalorder %s1863_s26, %s1555_s6  ;;  %p1557_p1 = pneg %p1869_p11 }
  0x65   : > { %s1560_s15 = scalar_lea.hbm %s2282_s0, 256  ;;  %p1561_p13 = scmp.lt.u32.totalorder %s1863_s26, %s2282_s0 }
  0x66   : > { %p1558_p3 = pnand %p1557_p1, %p1556_p12  ;;  %p1562_p0 = scmp.lt.u32.totalorder %s1560_s15, %s1555_s6 }
  0x67   : > { %p1564_p5 = scmp.lt.u32.totalorder %s1555_s6, %s1863_s26 }
  0x68   : > { %p1559_p8 = pneg %p1558_p3  ;;  %p1563_p2 = por %p1562_p0, %p1561_p13 }
  0x6a   : > { %p1565_p7 = por %p1564_p5, %p1563_p2 }
  0x6c   : > { %p1566_p9 = pnand %p1565_p7, %p1559_p8 }
  0x6e   : > { %1569 = shalt.err (!%p1566_p9)
}
  0x6f   : > { %s1570_s23 = scalar_lea.vmem %s1865_s30, 128  ;;  %s1673_s17 = smov [#allocation2]  }
  0x70   : > { %p1571_p12 = scmp.ne.s32.totalorder %s1865_s30, %s1570_s23  ;;  %s1575_s22 = sshll.u32 %s1673_s17, 4  ;;  %s1576_s22 = int_to_ptr.vmem [resolvable:$false] %s1575_s22 }
  0x71   : > { %s1577_s29 = scalar_lea.vmem %s1576_s22, 256  ;;  %p1578_p4 = scmp.lt.s32.totalorder %s1865_s30, %s1576_s22 }
  0x72   : > { %p1573_p3 = pnand %p1571_p12, %p1557_p1  ;;  %p1579_p13 = scmp.lt.s32.totalorder %s1577_s29, %s1570_s23 }
  0x74   : > { %p1574_p10 = pneg %p1573_p3  ;;  %p1580_p0 = por %p1579_p13, %p1578_p4 }
  0x76   : > { %p1581_p2 = pnand %p1580_p0, %p1574_p10 }
  0x78   : > { %1584 = shalt.err (!%p1581_p2)
}
  0x79   : > { %1360 = dma.hbm_to_vmem [thread:$0]  (!%p1869_p11), %s1863_s26, 128, %s1865_s30, %s227_s7  }
  0x7a   : > { %p2300_p8 = scmp.ne.s32.totalorder %s2291_s25, 0 }
  0x7b   : > { %s1901_s6 = sand.u32 (!%p2300_p8), 1, %s1655_s19  }
  0x7c   : > { %246 = sbr.rel (%p2300_p8) target bundleno = 2926 (0xb6e), region = 40  ;;  %s1196_s28 = sshll.u32 (!%p2300_p8), %s1901_s6, 3 }
  0x7d   : > { %s249_s8 = scalar_lea.sflag (!%p2300_p8), [#allocation3], %s1901_s6  ;;  %s1905_s15 = scalar_lea.vmem (!%p2300_p8), [#allocation2], %s1196_s28 }
  0x83   : > { %1630 = dma.done.wait (%p1844_p6), %s249_s8, 128  }
  0x84   : > { %1632 = vsyncadd (%p1844_p6), %s249_s8, 4294967168  ;;  %p2301_p4 = scmp.eq.s32.totalorder %s1728_s24, 0 }
  0x86   : > { %1634 = dma.done.wait (%p2301_p4), [#allocation7], 4096   ;;  %p2302_p10 = pmov %p2301_p4 }
  0x87   : > { %p2303_p11 = pmov %p2301_p4 }
  0x88   : > { %1636 = vsyncadd (%p2302_p10), [#allocation7], 4294963200 }
  0x89   : > { %1638 = dma.done.wait (%p2303_p11), [#allocation5], 16   ;;  %p2304_p1 = pmov %p2301_p4 }
  0x8b   : > { %1640 = vsyncadd (%p2304_p1), [#allocation5], 4294967280  ;;  %p2305_p5 = pmov %p2304_p1 }
  0x8c   : > { %p2306_p7 = pmov %p2304_p1 }
  0x8d   : > { %1642 = dma.done.wait (%p2305_p5), [#allocation11], 16  }
  0x8e   : > { %1644 = vsyncadd (%p2306_p7), [#allocation11], 4294967280 }
  0x8f   : > { %273 = sfence }
  0x90   : > { %v1923_v0 = vld [vmem:[#allocation8 + $0x4] ss:$8 sps:$4 sm:$0xff]   ;;  %v1925_v1 = vld [vmem:[#allocation8] ss:$8 sps:$4 sm:$0xff]   ;;  %v1674_v2 = vmov 0   ;;  %v1963_v15 = vld [vmem:[#allocation6 + $0x50] sm:$0xff]  }
  0x91   : > { %460 = vmatprep.mubr.bf16.mxu0 %v1674_v2  ;;  %428 = vmatprep.subr.bf16.mxu0 %v1923_v0  ;;  %v1929_v3 = vld [vmem:[#allocation8 + $0x14] ss:$8 sps:$4 sm:$0xff]   ;;  %v1932_v4 = vld [vmem:[#allocation8 + $0x10] ss:$8 sps:$4 sm:$0xff]   ;;  %v1935_v5 = vld [vmem:[#allocation8 + $0x24] ss:$8 sps:$4 sm:$0xff]  }
  0x92   : > { %429 = vmatpush1.bf16.msra.mxu0 %v1925_v1  ;;  %v1938_v6 = vld [vmem:[#allocation8 + $0x20] ss:$8 sps:$4 sm:$0xff]   ;;  %v1941_v7 = vld [vmem:[#allocation8 + $0x34] ss:$8 sps:$4 sm:$0xff]   ;;  %v1943_v8 = vld [vmem:[#allocation8 + $0x30] ss:$8 sps:$4 sm:$0xff]  }
  0x93   : > { %430 = vmatprep.subr.bf16.mxu0 %v1929_v3  ;;  %v1945_v9 = vld [vmem:[#allocation8 + $0x44] ss:$8 sps:$4 sm:$0xff]   ;;  %v1953_v12 = vld [vmem:[#allocation8 + $0x40] ss:$8 sps:$4 sm:$0xff]   ;;  %v1966_v16 = vld [vmem:[#allocation8 + $0x54] ss:$8 sps:$4 sm:$0xff]  }
  0x94   : > { %v1948_v10 = vld [vmem:[#allocation6 + $0x40] sm:$0xff]   ;;  %v1956_v13 = vld [vmem:[#allocation6 + $0x48] sm:$0xff]   ;;  %v1968_v17 = vld [vmem:[#allocation8 + $0x50] ss:$8 sps:$4 sm:$0xff]   ;;  %s472_s25 = sld [smem:[#allocation10]]  ;;  %s1234_s30 = sld [smem:[#allocation10 + $0x1]] }
  0x95   : > { %v1951_v11 = vld [vmem:[#allocation6] sm:$0xff]   ;;  %1258 = vmatprep.subr.bf16.mxu1 %v1948_v10  ;;  %v1959_v14 = vld [vmem:[#allocation6 + $0x8] sm:$0xff]   ;;  %v1973_v19 = vld [vmem:[#allocation6 + $0x10] sm:$0xff]   ;;  %s346_s11 = sld [smem:[#allocation9]]  ;;  %s1235_s27 = sld [smem:[#allocation9 + $0x1]] }
  0x96   : > { %431 = vmatpush1.bf16.msra.mxu0 %v1932_v4  ;;  %1259 = vmatpush3.bf16.msra.mxu1 %v1951_v11  ;;  %v1970_v18 = vld [vmem:[#allocation8 + $0x64] ss:$8 sps:$4 sm:$0xff]   ;;  %v1977_v20 = vld [vmem:[#allocation6 + $0x58] sm:$0xff]   ;;  %v1982_v22 = vld [vmem:[#allocation8 + $0x60] ss:$8 sps:$4 sm:$0xff]   ;;  %s1237_s10 = sld [smem:[#allocation9 + $0x2]] }
  0x97   : > { %432 = vmatprep.subr.bf16.mxu0 %v1935_v5  ;;  %1260 = vmatprep.subr.bf16.mxu1 %v1956_v13  ;;  %v1980_v21 = vld [vmem:[#allocation6 + $0x18] sm:$0xff]   ;;  %v1984_v23 = vld [vmem:[#allocation6 + $0x60] sm:$0xff]   ;;  %v2025_v29 = vld [vmem:[#allocation6 + $0x68] sm:$0xff]   ;;  %s1236_s16 = sld [smem:[#allocation10 + $0x2]]  ;;  %s1243_s17 = sld [smem:[#allocation9 + $0x3]] }
  0x98   : > { %v1986_v24 = vld [vmem:[#allocation8 + $0x74] ss:$8 sps:$4 sm:$0xff]   ;;  %v1993_v25 = vld [vmem:[#allocation6 + $0x20] sm:$0xff]   ;;  %v1996_v26 = vld [vmem:[#allocation8 + $0x70] ss:$8 sps:$4 sm:$0xff]   ;;  %s1242_s22 = sld [smem:[#allocation10 + $0x3]] }
  0x99   : > { %v1999_v27 = vld [vmem:[%s1905_s15] sm:$0xff]  ;;  %v2027_v30 = vld [vmem:[#allocation6 + $0x28] sm:$0xff]   ;;  %s1201_s28 = sshll.u32 %s1901_s6, 4  ;;  %s1257_s8 = sshll.u32 %s1728_s24, 8 }
  0x9a   : > { %433 = vmatpush1.bf16.msra.mxu0 %v1938_v6  ;;  %1261 = vmatpush3.bf16.msra.mxu1 %v1959_v14  ;;  %v347_v28 = vpack.c.bf16 %v1999_v27, %v1999_v27  ;;  %v2031_v31 = vld [vmem:[#allocation6 + $0x70] sm:$0xff]   ;;  %v2037_v33 = vld [vmem:[#allocation6 + $0x78] sm:$0xff]   ;;  %s473_s26 = ssub.f32 0.0, %s472_s25  ;;  %v477_v40 = vstv %s472_s25  ;;  %s664_s7 = smul.f32 0.1, %s1234_s30 }
  0x9b   : > { %434 = vmatprep.subr.bf16.mxu0 %v1941_v7  ;;  %1262 = vmatprep.subr.bf16.mxu1 %v1963_v15  ;;  %v2033_v32 = vld [vmem:[#allocation6 + $0x30] sm:$0xff]   ;;  %v2039_v34 = vld [vmem:[#allocation6 + $0x38] sm:$0xff]   ;;  %v469_v35 = vstv %s346_s11  ;;  %s295_s15 = scalar_lea.vmem [#allocation12], %s1201_s28  ;;  %s2236_s30 = scalar_lea.hbm %s2287_s5, %s1257_s8 }
  0x9c   : > { %v474_v37 = vstv %s473_s26  ;;  %s1075_s25 = sshll.u32 %s295_s15, 4  ;;  %s1061_s24 = scalar_lea.sflag [#allocation4], %s1901_s6  ;;  %s2238_s25 = int_to_ptr.vmem [resolvable:$true] %s1075_s25 }
  0x9d   : > { %s774_s23 = smul.f32 0.1, %s1236_s16  ;;  %p2307_p9 = scmp.ne.s32.totalorder %s2297_s13, 0 }
  0x9e   : > { %435 = vmatpush1.bf16.msra.mxu0 %v1943_v8  ;;  %1263 = vmatpush3.bf16.msra.mxu1 %v1973_v19  ;;  %s939_s29 = smul.f32 0.1, %s1242_s22 }
  0x9f   : > { %436 = vmatprep.subr.bf16.mxu0 %v1945_v9  ;;  %1264 = vmatprep.subr.bf16.mxu1 %v1977_v20 }
  0xa2   : > { %437 = vmatpush1.bf16.msra.mxu0 %v1953_v12  ;;  %1265 = vmatpush3.bf16.msra.mxu1 %v1980_v21 }
  0xa3   : > { %438 = vmatprep.subr.bf16.mxu0 %v1966_v16  ;;  %1266 = vmatprep.subr.bf16.mxu1 %v1984_v23 }
  0xa6   : > { %439 = vmatpush1.bf16.msra.mxu0 %v1968_v17  ;;  %1267 = vmatpush3.bf16.msra.mxu1 %v1993_v25 }
  0xa7   : > { %440 = vmatprep.subr.bf16.mxu0 %v1970_v18  ;;  %1268 = vmatprep.subr.bf16.mxu1 %v2025_v29 }
  0xaa   : > { %441 = vmatpush1.bf16.msra.mxu0 %v1982_v22  ;;  %1269 = vmatpush3.bf16.msra.mxu1 %v2027_v30 }
  0xab   : > { %442 = vmatprep.subr.bf16.mxu0 %v1986_v24  ;;  %1270 = vmatprep.subr.bf16.mxu1 %v2031_v31 }
  0xae   : > { %443 = vmatpush1.bf16.msra.mxu0 %v1996_v26  ;;  %1271 = vmatpush3.bf16.msra.mxu1 %v2033_v32 }
  0xaf   : > { %622 = vmatprep.subr.bf16.mxu0 %v1923_v0  ;;  %1272 = vmatprep.subr.bf16.mxu1 %v2037_v33 }
  0xb1   : > { %461 = vmatmul.mubr.bf16.vlgmr.msra.gmra.mrb[0].mxu0 %v347_v28 }
  0xb2   : > { %623 = vmatpush1.bf16.msra.mxu0 %v1925_v1  ;;  %654 = vmatprep.mubr.bf16.mxu0 %v1674_v2 }
  0xb3   : > { %624 = vmatprep.subr.bf16.mxu0 %v1929_v3  ;;  %1273 = vmatpush3.bf16.msra.mxu1 %v2039_v34 }
  0xb4   : > { %1280 = vmatprep.subr.bf16.mxu1 %v1948_v10 }
  0xb6   : > { %625 = vmatpush1.bf16.msra.mxu0 %v1932_v4 }
  0xb7   : > { %626 = vmatprep.subr.bf16.mxu0 %v1935_v5 }
  0xba   : > { %627 = vmatpush1.bf16.msra.mxu0 %v1938_v6 }
  0xbb   : > { %628 = vmatprep.subr.bf16.mxu0 %v1941_v7 }
  0xbe   : > { %629 = vmatpush1.bf16.msra.mxu0 %v1943_v8 }
  0xbf   : > { %630 = vmatprep.subr.bf16.mxu0 %v1945_v9 }
  0xc2   : > { %631 = vmatpush1.bf16.msra.mxu0 %v1953_v12 }
  0xc3   : > { %632 = vmatprep.subr.bf16.mxu0 %v1966_v16 }
  0xc6   : > { %633 = vmatpush1.bf16.msra.mxu0 %v1968_v17 }
  0xc7   : > { %634 = vmatprep.subr.bf16.mxu0 %v1970_v18 }
  0xca   : > { %635 = vmatpush1.bf16.msra.mxu0 %v1982_v22 }
  0xcb   : > { %636 = vmatprep.subr.bf16.mxu0 %v1986_v24 }
  0xce   : > { %637 = vmatpush1.bf16.msra.mxu0 %v1996_v26 }
  0xcf   : > { %732 = vmatprep.subr.bf16.mxu0 %v1923_v0 }
 0x184   : > { %v462_v36 = vpop.f32.mrb[0].mxu0 }
 0x185   : > { %v470_v38 = vmul.f32 %v469_v35, %v462_v36  ;;  %v464_v39 = vpop.f32.mrb[1].mxu0 }
 0x186   : > { %v471_v41 = vmul.f32 %v469_v35, %v464_v39  ;;  %v466_v42 = vpop.f32.mrb[2].mxu0  ;;  %v675_v35 = vstv %s1235_s27  ;;  %s1585_s27 = scalar_lea.vmem %s2238_s25, 256 }
 0x187   : > { %v475_v43 = vmax.f32 %v474_v37, %v470_v38  ;;  %v467_v44 = vpop.f32.mrb[3].mxu0  ;;  %p1586_p6 = scmp.ne.s32.totalorder %s2238_s25, %s1585_s27 }
 0x188   : > { %v476_v45 = vmax.f32 %v474_v37, %v471_v41 }
 0x189   : > { %v478_v46 = vmin.f32 %v477_v40, %v475_v43  ;;  %p1587_p12 = pnand %p1586_p6, %p2307_p9 }
 0x18a   : > { %v479_v47 = vmin.f32 %v477_v40, %v476_v45 }
 0x18b   : > { %v2044_v48 = vsub.f32 %v470_v38, %v478_v46  ;;  %p1588_p3 = pneg %p1587_p12 }
 0x18c   : > { %v2046_v49 = vsub.f32 %v471_v41, %v479_v47 }
 0x18d   : > { %v482_v51 = vpack.c.bf16 %v2044_v48, %v2044_v48  ;;  %v665_v59 = vand.u32 2147483647, %v2044_v48 }
 0x18e   : > { %v483_v50 = vpack.c.bf16 %v2046_v49, %v2046_v49  ;;  %v666_v60 = vand.u32 2147483647, %v2046_v49 }
 0x18f   : > { %v667_v61 = vadd.f32 0.1, %v665_v59 }
 0x190   : > { %612 = vmatprep.mubr.bf16.mxu1 %v483_v50  ;;  %v668_v62 = vadd.f32 0.1, %v666_v60 }
 0x191   : > { %613 = vmatmul.mubr.bf16.vlgmr.msra.gmra.mrb[0].mxu1 %v482_v51  ;;  %1457 = vrcp.f32 %v667_v61 }
 0x192   : > { %1281 = vmatpush3.bf16.msra.mxu1 %v1951_v11  ;;  %1459 = vrcp.f32 %v668_v62 }
 0x193   : > { %1282 = vmatprep.subr.bf16.mxu1 %v1956_v13 }
 0x196   : > { %1283 = vmatpush3.bf16.msra.mxu1 %v1959_v14 }
 0x197   : > { %1284 = vmatprep.subr.bf16.mxu1 %v1963_v15 }
 0x19a   : > { %1285 = vmatpush3.bf16.msra.mxu1 %v1973_v19 }
 0x19b   : > { %1286 = vmatprep.subr.bf16.mxu1 %v1977_v20  ;;  %v1458_v63 = vpop.eup %1457 }
 0x19c   : > { %v1460_v28 = vpop.eup %1459 }
 0x19e   : > { %1287 = vmatpush3.bf16.msra.mxu1 %v1980_v21 }
 0x19f   : > { %1288 = vmatprep.subr.bf16.mxu1 %v1984_v23 }
 0x1a2   : > { %1289 = vmatpush3.bf16.msra.mxu1 %v1993_v25 }
 0x1a3   : > { %1290 = vmatprep.subr.bf16.mxu1 %v2025_v29 }
 0x1a6   : > { %1291 = vmatpush3.bf16.msra.mxu1 %v2027_v30 }
 0x1a7   : > { %1292 = vmatprep.subr.bf16.mxu1 %v2031_v31 }
 0x1aa   : > { %1293 = vmatpush3.bf16.msra.mxu1 %v2033_v32 }
 0x1ab   : > { %1294 = vmatprep.subr.bf16.mxu1 %v2037_v33 }
 0x1ae   : > { %1295 = vmatpush3.bf16.msra.mxu1 %v2039_v34 }
 0x1af   : > { %1302 = vmatprep.subr.bf16.mxu1 %v1948_v10  ;;  %v669_v10 = vstv %s664_s7  ;;  %s1676_s7 = smov [#allocation12]  }
 0x1b0   : > { %v671_v36 = vmul.f32 %v1458_v63, %v669_v10  ;;  %v673_v38 = vmul.f32 %v1460_v28, %v669_v10 }
 0x1b2   : > { %v680_v43 = vsub.f32 0.0, %v671_v36  ;;  %v681_v46 = vsub.f32 0.0, %v673_v38 }
 0x264   : > { %v1274_v52 = vpop.f32.mrb[0].mxu1 }
 0x265   : > { %v1275_v53 = vpop.f32.mrb[1].mxu1 }
 0x266   : > { %v1276_v54 = vadd.f32 %v1275_v53, %v1274_v52  ;;  %v1277_v55 = vpop.f32.mrb[2].mxu1 }
 0x267   : > { %v1278_v56 = vpop.f32.mrb[3].mxu1 }
 0x268   : > { %v620_v57 = vsub.f32 %v1276_v54, %v1999_v27 }
 0x26a   : > { %v621_v58 = vpack.c.bf16 %v620_v57, %v620_v57 }
 0x26c   : > { %655 = vmatmul.mubr.bf16.vlgmr.msra.gmra.mrb[4].mxu0 %v621_v58 }
 0x26d   : > { %733 = vmatpush1.bf16.msra.mxu0 %v1925_v1  ;;  %764 = vmatprep.mubr.bf16.mxu0 %v1674_v2 }
 0x26e   : > { %734 = vmatprep.subr.bf16.mxu0 %v1929_v3 }
 0x271   : > { %735 = vmatpush1.bf16.msra.mxu0 %v1932_v4 }
 0x272   : > { %736 = vmatprep.subr.bf16.mxu0 %v1935_v5 }
 0x275   : > { %737 = vmatpush1.bf16.msra.mxu0 %v1938_v6 }
 0x276   : > { %738 = vmatprep.subr.bf16.mxu0 %v1941_v7 }
 0x279   : > { %739 = vmatpush1.bf16.msra.mxu0 %v1943_v8 }
 0x27a   : > { %740 = vmatprep.subr.bf16.mxu0 %v1945_v9 }
 0x27d   : > { %741 = vmatpush1.bf16.msra.mxu0 %v1953_v12 }
 0x27e   : > { %742 = vmatprep.subr.bf16.mxu0 %v1966_v16 }
 0x281   : > { %743 = vmatpush1.bf16.msra.mxu0 %v1968_v17 }
 0x282   : > { %744 = vmatprep.subr.bf16.mxu0 %v1970_v18 }
 0x285   : > { %745 = vmatpush1.bf16.msra.mxu0 %v1982_v22 }
 0x286   : > { %746 = vmatprep.subr.bf16.mxu0 %v1986_v24 }
 0x289   : > { %747 = vmatpush1.bf16.msra.mxu0 %v1996_v26 }
 0x28a   : > { %897 = vmatprep.subr.bf16.mxu0 %v1923_v0 }
 0x33f   : > { %v656_v37 = vpop.f32.mrb[4].mxu0 }
 0x340   : > { %v676_v39 = vmul.f32 %v675_v35, %v656_v37  ;;  %v658_v0 = vpop.f32.mrb[5].mxu0  ;;  %v779_v37 = vstv %s774_s23 }
 0x341   : > { %v677_v40 = vmul.f32 %v675_v35, %v658_v0  ;;  %v660_v41 = vpop.f32.mrb[6].mxu0 }
 0x342   : > { %v678_v42 = vsub.f32 %v2044_v48, %v676_v39  ;;  %v661_v44 = vpop.f32.mrb[7].mxu0 }
 0x343   : > { %v679_v45 = vsub.f32 %v2046_v49, %v677_v40 }
 0x344   : > { %v682_v47 = vmax.f32 %v680_v43, %v678_v42 }
 0x345   : > { %v683_v50 = vmax.f32 %v681_v46, %v679_v45 }
 0x346   : > { %v684_v51 = vmin.f32 %v671_v36, %v682_v47 }
 0x347   : > { %v685_v52 = vmin.f32 %v673_v38, %v683_v50 }
 0x348   : > { %v2090_v53 = vsub.f32 %v678_v42, %v684_v51 }
 0x349   : > { %v2092_v54 = vsub.f32 %v679_v45, %v685_v52 }
 0x34a   : > { %v688_v56 = vpack.c.bf16 %v2090_v53, %v2090_v53  ;;  %v775_v62 = vand.u32 2147483647, %v2090_v53 }
 0x34b   : > { %v689_v55 = vpack.c.bf16 %v2092_v54, %v2092_v54  ;;  %v776_v63 = vand.u32 2147483647, %v2092_v54 }
 0x34c   : > { %v777_v10 = vadd.f32 0.1, %v775_v62 }
 0x34d   : > { %722 = vmatprep.mubr.bf16.mxu1 %v689_v55  ;;  %v778_v28 = vadd.f32 0.1, %v776_v63 }
 0x34e   : > { %723 = vmatmul.mubr.bf16.vlgmr.msra.gmra.mrb[4].mxu1 %v688_v56  ;;  %1461 = vrcp.f32 %v777_v10 }
 0x34f   : > { %1303 = vmatpush3.bf16.msra.mxu1 %v1951_v11  ;;  %1463 = vrcp.f32 %v778_v28 }
 0x350   : > { %1304 = vmatprep.subr.bf16.mxu1 %v1956_v13 }
 0x353   : > { %1305 = vmatpush3.bf16.msra.mxu1 %v1959_v14 }
 0x354   : > { %1306 = vmatprep.subr.bf16.mxu1 %v1963_v15 }
 0x357   : > { %1307 = vmatpush3.bf16.msra.mxu1 %v1973_v19 }
 0x358   : > { %1308 = vmatprep.subr.bf16.mxu1 %v1977_v20  ;;  %v1462_v35 = vpop.eup %1461 }
 0x359   : > { %v1464_v36 = vpop.eup %1463  ;;  %v781_v38 = vmul.f32 %v1462_v35, %v779_v37 }
 0x35a   : > { %v783_v39 = vmul.f32 %v1464_v36, %v779_v37 }
 0x35b   : > { %1309 = vmatpush3.bf16.msra.mxu1 %v1980_v21  ;;  %v790_v0 = vsub.f32 0.0, %v781_v38 }
 0x35c   : > { %1310 = vmatprep.subr.bf16.mxu1 %v1984_v23  ;;  %v791_v40 = vsub.f32 0.0, %v783_v39 }
 0x35f   : > { %1311 = vmatpush3.bf16.msra.mxu1 %v1993_v25 }
 0x360   : > { %1312 = vmatprep.subr.bf16.mxu1 %v2025_v29 }
 0x363   : > { %1313 = vmatpush3.bf16.msra.mxu1 %v2027_v30 }
 0x364   : > { %1314 = vmatprep.subr.bf16.mxu1 %v2031_v31 }
 0x367   : > { %1315 = vmatpush3.bf16.msra.mxu1 %v2033_v32 }
 0x368   : > { %1316 = vmatprep.subr.bf16.mxu1 %v2037_v33 }
 0x36b   : > { %1317 = vmatpush3.bf16.msra.mxu1 %v2039_v34 }
 0x421   : > { %v1296_v11 = vpop.f32.mrb[4].mxu1 }
 0x422   : > { %v1297_v13 = vpop.f32.mrb[5].mxu1 }
 0x423   : > { %v1298_v14 = vadd.f32 %v1297_v13, %v1296_v11  ;;  %v1299_v15 = vpop.f32.mrb[6].mxu1 }
 0x424   : > { %v1300_v19 = vpop.f32.mrb[7].mxu1 }
 0x425   : > { %v730_v20 = vsub.f32 %v1298_v14, %v1999_v27 }
 0x427   : > { %v731_v21 = vpack.c.bf16 %v730_v20, %v730_v20 }
 0x429   : > { %765 = vmatmul.mubr.bf16.vlgmr.msra.gmra.mrb[8].mxu0 %v731_v21 }
 0x42a   : > { %898 = vmatpush1.bf16.msra.mxu0 %v1925_v1  ;;  %929 = vmatprep.mubr.bf16.mxu0 %v1674_v2  ;;  %v785_v1 = vstv %s1237_s10  ;;  %s1589_s10 = sshll.u32 %s1676_s7, 4  ;;  %s1590_s10 = int_to_ptr.vmem [resolvable:$false] %s1589_s10 }
 0x42b   : > { %899 = vmatprep.subr.bf16.mxu0 %v1929_v3  ;;  %s1591_s16 = scalar_lea.vmem %s1590_s10, 512  ;;  %p1592_p13 = scmp.lt.s32.totalorder %s2238_s25, %s1590_s10 }
 0x42c   : > { %p1593_p0 = scmp.lt.s32.totalorder %s1591_s16, %s1585_s27 }
 0x42e   : > { %900 = vmatpush1.bf16.msra.mxu0 %v1932_v4  ;;  %p1594_p2 = por %p1593_p0, %p1592_p13 }
 0x42f   : > { %901 = vmatprep.subr.bf16.mxu0 %v1935_v5 }
 0x430   : > { %p1595_p8 = pnand %p1594_p2, %p1588_p3 }
 0x432   : > { %902 = vmatpush1.bf16.msra.mxu0 %v1938_v6 }
 0x433   : > { %903 = vmatprep.subr.bf16.mxu0 %v1941_v7 }
 0x436   : > { %904 = vmatpush1.bf16.msra.mxu0 %v1943_v8 }
 0x437   : > { %905 = vmatprep.subr.bf16.mxu0 %v1945_v9 }
 0x43a   : > { %906 = vmatpush1.bf16.msra.mxu0 %v1953_v12 }
 0x43b   : > { %907 = vmatprep.subr.bf16.mxu0 %v1966_v16 }
 0x43e   : > { %908 = vmatpush1.bf16.msra.mxu0 %v1968_v17 }
 0x43f   : > { %909 = vmatprep.subr.bf16.mxu0 %v1970_v18 }
 0x442   : > { %910 = vmatpush1.bf16.msra.mxu0 %v1982_v22 }
 0x443   : > { %911 = vmatprep.subr.bf16.mxu0 %v1986_v24 }
 0x446   : > { %912 = vmatpush1.bf16.msra.mxu0 %v1996_v26  ;;  %v1675_v26 = vmov 0.0  }
 0x4fc   : > { %v766_v2 = vpop.f32.mrb[8].mxu0 }
 0x4fd   : > { %v786_v3 = vmul.f32 %v785_v1, %v766_v2  ;;  %v768_v4 = vpop.f32.mrb[9].mxu0  ;;  %v950_v2 = vstv %s1243_s17 }
 0x4fe   : > { %v787_v5 = vmul.f32 %v785_v1, %v768_v4  ;;  %v770_v6 = vpop.f32.mrb[10].mxu0 }
 0x4ff   : > { %v2131_v7 = vsub.f32 %v2090_v53, %v786_v3  ;;  %v771_v8 = vpop.f32.mrb[11].mxu0 }
 0x500   : > { %v2134_v9 = vsub.f32 %v2092_v54, %v787_v5 }
 0x501   : > { %v2137_v12 = vand.u32 2147483647, %v2131_v7  ;;  %v792_v41 = vmax.f32 %v790_v0, %v2131_v7 }
 0x502   : > { %v2140_v16 = vand.u32 2147483647, %v2134_v9  ;;  %v793_v42 = vmax.f32 %v791_v40, %v2134_v9 }
 0x503   : > { %vm801_vm0 = vcmp.lt.f32.partialorder %v2137_v12, inf  ;;  %v794_v45 = vmin.f32 %v781_v38, %v792_v41 }
 0x504   : > { %vm802_vm1 = vcmp.lt.f32.partialorder %v2140_v16, inf  ;;  %v803_v17 = vsel %vm801_vm0, %v2137_v12, -inf  ;;  %v795_v46 = vmin.f32 %v783_v39, %v793_v42 }
 0x505   : > { %v804_v18 = vsel %vm802_vm1, %v2140_v16, -inf  ;;  %v796_v51 = vsub.f32 %v2131_v7, %v794_v45 }
 0x506   : > { %v805_v22 = vmax.f32 %v803_v17, %v804_v18  ;;  %v797_v52 = vsub.f32 %v2134_v9, %v795_v46 }
 0x508   : > { %806 = vmax.xlane.f32.xlu0 %v805_v22 }
 0x595   : > { %v807_v23 = vpop.xlane.xlu0 %806 }
 0x596   : > { %vm821_vm2 = vcmp.lt.f32.partialorder %v2137_v12, %v807_v23  ;;  %vm822_vm3 = vcmp.lt.f32.partialorder %v2140_v16, %v807_v23  ;;  %vm808_vm4 = vcmp.ge.f32.partialorder %v803_v17, %v807_v23  ;;  %vm809_vm5 = vcmp.ge.f32.partialorder %v804_v18, %v807_v23 }
 0x597   : > { %v823_v24 = vsel %vm821_vm2, %v2137_v12, -inf  ;;  %v824_v25 = vsel %vm822_vm3, %v2140_v16, -inf  ;;  %v1238_v29 = vsel %vm808_vm4, 1.0, %v1675_v26  ;;  %v1239_v30 = vsel %vm809_vm5, 1.0, %v1675_v26 }
 0x598   : > { %v825_v31 = vmax.f32 %v823_v24, %v824_v25  ;;  %v814_v32 = vadd.f32 %v1239_v30, %v1238_v29 }
 0x59a   : > { %826 = vmax.xlane.f32.xlu0 %v825_v31  ;;  %815 = vadd.xlane.f32.xlu1 %v814_v32 }
 0x627   : > { %v827_v33 = vpop.xlane.xlu0 %826  ;;  %v816_v34 = vpop.xlane.xlu1 %815 }
 0x628   : > { %vm820_vm6 = vcmp.lt.f32.partialorder %v816_v34, 3.0  ;;  %vm828_vm7 = vcmp.ge.f32.partialorder %v823_v24, %v827_v33  ;;  %vm829_vm8 = vcmp.ge.f32.partialorder %v824_v25, %v827_v33 }
 0x629   : > { %v1240_v48 = vsel %vm828_vm7, 1.0, %v1675_v26  ;;  %v1241_v49 = vsel %vm829_vm8, 1.0, %v1675_v26  ;;  %v837_v57 = vsel %vm820_vm6, %v827_v33, %v807_v23 }
 0x62a   : > { %v834_v58 = vadd.f32 %v1241_v49, %v1240_v48  ;;  %vm841_vm9 = vcmp.lt.f32.partialorder %v2137_v12, %v837_v57  ;;  %vm842_vm10 = vcmp.lt.f32.partialorder %v2140_v16, %v837_v57 }
 0x62b   : > { %v843_v59 = vsel %vm841_vm9, %v2137_v12, -inf  ;;  %v844_v60 = vsel %vm842_vm10, %v2140_v16, -inf }
 0x62c   : > { %835 = vadd.xlane.f32.xlu1 %v834_v58  ;;  %v845_v61 = vmax.f32 %v843_v59, %v844_v60 }
 0x62e   : > { %846 = vmax.xlane.f32.xlu0 %v845_v61 }
 0x6b9   : > { %v836_v43 = vpop.xlane.xlu1 %835 }
 0x6ba   : > { %v838_v44 = vadd.f32 %v836_v43, %v816_v34 }
 0x6bb   : > { %v847_v50 = vpop.xlane.xlu0 %846 }
 0x6bc   : > { %v839_v47 = vsel %vm820_vm6, %v838_v44, %v816_v34 }
 0x6bd   : > { %vm840_vm11 = vcmp.lt.f32.partialorder %v839_v47, 3.0 }
 0x6be   : > { %v848_v53 = vsel %vm840_vm11, %v847_v50, %v837_v57 }
 0x6bf   : > { %vm849_vm12 = vcmp.gt.f32.partialorder %v2137_v12, %v848_v53  ;;  %vm850_vm13 = vcmp.gt.f32.partialorder %v2140_v16, %v848_v53 }
 0x6c0   : > { %v2169_v54 = vsel %vm849_vm12, %v2131_v7, %v796_v51  ;;  %v2172_v55 = vsel %vm850_vm13, %v2134_v9, %v797_v52 }
 0x6c1   : > { %v853_v56 = vpack.c.bf16 %v2169_v54, %v2169_v54  ;;  %v854_v11 = vpack.c.bf16 %v2172_v55, %v2172_v55 }
 0x6c3   : > { %887 = vmatprep.mubr.bf16.mxu1 %v854_v11  ;;  %v941_v11 = vand.u32 2147483647, %v2172_v55 }
 0x6c4   : > { %888 = vmatmul.mubr.bf16.vlgmr.msra.gmra.mrb[8].mxu1 %v853_v56  ;;  %v940_v56 = vand.u32 2147483647, %v2169_v54 }
 0x797   : > { %v1318_v13 = vpop.f32.mrb[8].mxu1 }
 0x798   : > { %v1319_v14 = vpop.f32.mrb[9].mxu1 }
 0x799   : > { %v1320_v15 = vadd.f32 %v1319_v14, %v1318_v13  ;;  %v1321_v19 = vpop.f32.mrb[10].mxu1  ;;  %v942_v13 = vadd.f32 0.1, %v940_v56  ;;  %v943_v14 = vadd.f32 0.1, %v941_v11 }
 0x79a   : > { %v1322_v20 = vpop.f32.mrb[11].mxu1  ;;  %v944_v19 = vstv %s939_s29 }
 0x79b   : > { %v895_v21 = vsub.f32 %v1320_v15, %v1999_v27  ;;  %1465 = vrcp.f32 %v942_v13 }
 0x79c   : > { %1467 = vrcp.f32 %v943_v14 }
 0x79d   : > { %v896_v1 = vpack.c.bf16 %v895_v21, %v895_v21 }
 0x79f   : > { %930 = vmatmul.mubr.bf16.vlgmr.msra.gmra.mrb[12].mxu0 %v896_v1 }
 0x872   : > { %v931_v3 = vpop.f32.mrb[12].mxu0 }
 0x873   : > { %v951_v4 = vmul.f32 %v950_v2, %v931_v3  ;;  %v933_v5 = vpop.f32.mrb[13].mxu0 }
 0x874   : > { %v952_v6 = vmul.f32 %v950_v2, %v933_v5  ;;  %v935_v7 = vpop.f32.mrb[14].mxu0 }
 0x875   : > { %v2180_v8 = vsub.f32 %v2169_v54, %v951_v4  ;;  %v936_v9 = vpop.f32.mrb[15].mxu0 }
 0x876   : > { %v2183_v12 = vsub.f32 %v2172_v55, %v952_v6 }
 0x877   : > { %v2186_v16 = vand.u32 2147483647, %v2180_v8 }
 0x878   : > { %v2189_v27 = vand.u32 2147483647, %v2183_v12 }
 0x879   : > { %vm966_vm14 = vcmp.lt.f32.partialorder %v2186_v16, inf }
 0x87a   : > { %vm967_vm15 = vcmp.lt.f32.partialorder %v2189_v27, inf  ;;  %v968_v17 = vsel %vm966_vm14, %v2186_v16, -inf }
 0x87b   : > { %v969_v18 = vsel %vm967_vm15, %v2189_v27, -inf }
 0x87c   : > { %v970_v22 = vmax.f32 %v968_v17, %v969_v18 }
 0x87e   : > { %971 = vmax.xlane.f32.xlu1 %v970_v22 }
 0x90b   : > { %v972_v23 = vpop.xlane.xlu1 %971 }
 0x90c   : > { %vm986_vm0 = vcmp.lt.f32.partialorder %v2186_v16, %v972_v23  ;;  %vm987_vm1 = vcmp.lt.f32.partialorder %v2189_v27, %v972_v23  ;;  %vm973_vm2 = vcmp.ge.f32.partialorder %v968_v17, %v972_v23  ;;  %vm974_vm3 = vcmp.ge.f32.partialorder %v969_v18, %v972_v23 }
 0x90d   : > { %v988_v24 = vsel %vm986_vm0, %v2186_v16, -inf  ;;  %v989_v25 = vsel %vm987_vm1, %v2189_v27, -inf  ;;  %v1244_v29 = vsel %vm973_vm2, 1.0, %v1675_v26  ;;  %v1245_v30 = vsel %vm974_vm3, 1.0, %v1675_v26 }
 0x90e   : > { %v990_v31 = vmax.f32 %v988_v24, %v989_v25  ;;  %v979_v32 = vadd.f32 %v1245_v30, %v1244_v29 }
 0x910   : > { %991 = vmax.xlane.f32.xlu0 %v990_v31  ;;  %980 = vadd.xlane.f32.xlu1 %v979_v32 }
 0x99d   : > { %v992_v33 = vpop.xlane.xlu0 %991  ;;  %v981_v34 = vpop.xlane.xlu1 %980 }
 0x99e   : > { %vm985_vm4 = vcmp.lt.f32.partialorder %v981_v34, 5.0  ;;  %vm993_vm5 = vcmp.ge.f32.partialorder %v988_v24, %v992_v33  ;;  %vm994_vm6 = vcmp.ge.f32.partialorder %v989_v25, %v992_v33 }
 0x99f   : > { %v1246_v48 = vsel %vm993_vm5, 1.0, %v1675_v26  ;;  %v1247_v49 = vsel %vm994_vm6, 1.0, %v1675_v26  ;;  %v1002_v57 = vsel %vm985_vm4, %v992_v33, %v972_v23 }
 0x9a0   : > { %v999_v58 = vadd.f32 %v1247_v49, %v1246_v48  ;;  %vm1006_vm7 = vcmp.lt.f32.partialorder %v2186_v16, %v1002_v57  ;;  %vm1007_vm8 = vcmp.lt.f32.partialorder %v2189_v27, %v1002_v57 }
 0x9a1   : > { %v1008_v59 = vsel %vm1006_vm7, %v2186_v16, -inf  ;;  %v1009_v60 = vsel %vm1007_vm8, %v2189_v27, -inf }
 0x9a2   : > { %1000 = vadd.xlane.f32.xlu0 %v999_v58  ;;  %v1010_v61 = vmax.f32 %v1008_v59, %v1009_v60 }
 0x9a4   : > { %1011 = vmax.xlane.f32.xlu1 %v1010_v61 }
 0xa2f   : > { %v1001_v62 = vpop.xlane.xlu0 %1000 }
 0xa30   : > { %v1003_v63 = vadd.f32 %v1001_v62, %v981_v34 }
 0xa31   : > { %v1012_v10 = vpop.xlane.xlu1 %1011 }
 0xa32   : > { %v1004_v28 = vsel %vm985_vm4, %v1003_v63, %v981_v34  ;;  %vm1013_vm9 = vcmp.ge.f32.partialorder %v1008_v59, %v1012_v10  ;;  %vm1014_vm10 = vcmp.ge.f32.partialorder %v1009_v60, %v1012_v10 }
 0xa33   : > { %vm1005_vm11 = vcmp.lt.f32.partialorder %v1004_v28, 5.0  ;;  %v1248_v35 = vsel %vm1013_vm9, 1.0, %v1675_v26  ;;  %v1249_v36 = vsel %vm1014_vm10, 1.0, %v1675_v26 }
 0xa34   : > { %v1022_v37 = vsel %vm1005_vm11, %v1012_v10, %v1002_v57  ;;  %v1019_v38 = vadd.f32 %v1249_v36, %v1248_v35 }
 0xa35   : > { %vm1026_vm12 = vcmp.lt.f32.partialorder %v2186_v16, %v1022_v37  ;;  %vm1027_vm13 = vcmp.lt.f32.partialorder %v2189_v27, %v1022_v37 }
 0xa36   : > { %1020 = vadd.xlane.f32.xlu0 %v1019_v38  ;;  %v1028_v39 = vsel %vm1026_vm12, %v2186_v16, -inf  ;;  %v1029_v0 = vsel %vm1027_vm13, %v2189_v27, -inf }
 0xa37   : > { %v1030_v40 = vmax.f32 %v1028_v39, %v1029_v0 }
 0xa39   : > { %1031 = vmax.xlane.f32.xlu1 %v1030_v40 }
 0xac3   : > { %v1021_v41 = vpop.xlane.xlu0 %1020 }
 0xac4   : > { %v1023_v42 = vadd.f32 %v1021_v41, %v1004_v28 }
 0xac6   : > { %v1024_v43 = vsel %vm1005_vm11, %v1023_v42, %v1004_v28  ;;  %v1032_v44 = vpop.xlane.xlu1 %1031 }
 0xac7   : > { %vm1025_vm14 = vcmp.lt.f32.partialorder %v1024_v43, 5.0  ;;  %vm1033_vm15 = vcmp.ge.f32.partialorder %v1028_v39, %v1032_v44  ;;  %vm1034_vm0 = vcmp.ge.f32.partialorder %v1029_v0, %v1032_v44 }
 0xac8   : > { %v1042_v45 = vsel %vm1025_vm14, %v1032_v44, %v1022_v37  ;;  %v1250_v46 = vsel %vm1033_vm15, 1.0, %v1675_v26  ;;  %v1251_v47 = vsel %vm1034_vm0, 1.0, %v1675_v26  ;;  %v1466_v26 = vpop.eup %1465 }
 0xac9   : > { %v1039_v50 = vadd.f32 %v1251_v47, %v1250_v46  ;;  %vm1046_vm1 = vcmp.lt.f32.partialorder %v2186_v16, %v1042_v45  ;;  %vm1047_vm2 = vcmp.lt.f32.partialorder %v2189_v27, %v1042_v45  ;;  %v1468_v15 = vpop.eup %1467  ;;  %v946_v20 = vmul.f32 %v1466_v26, %v944_v19 }
 0xaca   : > { %v1048_v51 = vsel %vm1046_vm1, %v2186_v16, -inf  ;;  %v1049_v52 = vsel %vm1047_vm2, %v2189_v27, -inf  ;;  %v948_v21 = vmul.f32 %v1468_v15, %v944_v19 }
 0xacb   : > { %1040 = vadd.xlane.f32.xlu0 %v1039_v50  ;;  %v1050_v53 = vmax.f32 %v1048_v51, %v1049_v52  ;;  %v955_v1 = vsub.f32 0.0, %v946_v20 }
 0xacc   : > { %v956_v2 = vsub.f32 0.0, %v948_v21 }
 0xacd   : > { %1051 = vmax.xlane.f32.xlu1 %v1050_v53  ;;  %v957_v3 = vmax.f32 %v955_v1, %v2180_v8 }
 0xace   : > { %v958_v54 = vmax.f32 %v956_v2, %v2183_v12 }
 0xacf   : > { %v959_v5 = vmin.f32 %v946_v20, %v957_v3 }
 0xad0   : > { %v960_v6 = vmin.f32 %v948_v21, %v958_v54 }
 0xad1   : > { %v961_v17 = vsub.f32 %v2180_v8, %v959_v5 }
 0xad2   : > { %v962_v18 = vsub.f32 %v2183_v12, %v960_v6 }
 0xb58   : > { %v1041_v55 = vpop.xlane.xlu0 %1040 }
 0xb59   : > { %v1043_v4 = vadd.f32 %v1041_v55, %v1024_v43 }
 0xb5a   : > { %v1052_v9 = vpop.xlane.xlu1 %1051 }
 0xb5b   : > { %v1044_v7 = vsel %vm1025_vm14, %v1043_v4, %v1024_v43 }
 0xb5c   : > { %vm1045_vm3 = vcmp.lt.f32.partialorder %v1044_v7, 5.0 }
 0xb5d   : > { %v1053_v22 = vsel %vm1045_vm3, %v1052_v9, %v1042_v45 }
 0xb5e   : > { %vm1054_vm4 = vcmp.gt.f32.partialorder %v2186_v16, %v1053_v22  ;;  %vm1055_vm5 = vcmp.gt.f32.partialorder %v2189_v27, %v1053_v22 }
 0xb5f   : > { %v1056_v23 = vsel %vm1054_vm4, %v2180_v8, %v961_v17  ;;  %v1057_v24 = vsel %vm1055_vm5, %v2183_v12, %v962_v18 }
 0xb60   : > { %1058 = vst [vmem:[%s295_s15] sm:$0xff] %v1056_v23  ;;  %1059 = vst [vmem:[%s295_s15 + $0x8] sm:$0xff] %v1057_v24 }
 0xb61   : > { %1598 = shalt.err (!%p1595_p8)
}
 0xb62   : > { %s1599_s6 = scalar_lea.hbm %s2236_s30, 256  ;;  %s1603_s22 = scalar_lea.hbm %s2287_s5, 512 }
 0xb63   : > { %p1600_p4 = scmp.ne.s32.totalorder %s2236_s30, %s1599_s6  ;;  %p1604_p1 = scmp.lt.u32.totalorder %s2236_s30, %s2287_s5 }
 0xb64   : > { %p1605_p5 = scmp.lt.u32.totalorder %s1603_s22, %s1599_s6  ;;  %p1607_p6 = scmp.lt.u32.totalorder %s1599_s6, %s2236_s30 }
 0xb65   : > { %p1601_p10 = pnand %p1600_p4, %p2307_p9 }
 0xb66   : > { %p1606_p7 = por %p1605_p5, %p1604_p1 }
 0xb67   : > { %p1602_p11 = pneg %p1601_p10 }
 0xb68   : > { %p1608_p12 = por %p1607_p6, %p1606_p7 }
 0xb6a   : > { %p1609_p3 = pnand %p1608_p12, %p1602_p11 }
 0xb6c   : > { %1612 = shalt.err (!%p1609_p3)
}
 0xb6d   : > { %1342 = dma.vmem_to_hbm [thread:$0]  (%p2307_p9), %s2238_s25, 256, %s2236_s30, %s1061_s24  }
 0xb6e PF: > { %s1087_s8 = sand.u32 1, %s1651_s18   ;;  %p2308_p13 = scmp.ne.s32.totalorder %s2298_s14, 0 }
 0xb6f   : > { %p2309_p0 = scmp.ge.s32.totalorder %s1663_s21, 2  ;;  %s1088_s15 = scalar_lea.sflag [#allocation4], %s1087_s8 }
 0xb71   : > { %p1362_p2 = pnand %p2309_p0, %p2308_p13 }
 0xb73   : > { %1646 = dma.done.wait (!%p1362_p2), %s1088_s15, 256  }
 0xb74   : > { %1648 = vsyncadd (!%p1362_p2), %s1088_s15, 4294967040  ;;  %p21_p8 = scmp.ge.s32.totalorder %s1825_s12, 4   ;;  %s2310_s18 = smov %s1655_s19 }
 0xb75   : > { %s2311_s19 = smov %s1659_s20  ;;  %s2312_s20 = smov %s1836_s9 }
 0xb76   : > { %s2313_s21 = smov %s1825_s12  ;;  %23 = sbr.rel (!%p21_p8) target bundleno = 8 (0x8), region = 102 }
 0xb7d   :  { %1093 = vsyncpa [#allocation3], 1 }
 0xb7e   :  { %1095 = vsyncpa [#allocation3 + $0x1], 1 }
 0xb7f   :  { %1096 = vsyncpa [#allocation7], 1 }
 0xb80   :  { %1097 = vsyncpa [#allocation4], 1 }
 0xb81   :  { %1099 = vsyncpa [#allocation4 + $0x1], 1 }
 0xb82   :  { %1100 = vsyncpa [#allocation5], 1 }
 0xb83   :  { %1102 = vsyncpa [#allocation5 + $0x1], 1 }
 0xb84   :  { %1103 = vsyncpa [#allocation11], 1 }

</bundles_post_ra>
